<compile_context>
chip_gen: v7x
topology: tpu7x:2x2x1
jax: 0.10.0
libtpu: 0.0.40
codegen_flags: <defaults>
</compile_context>

<pallas_src>
import numpy as np
import jax
import jax.numpy as jnp
from jax.experimental import pallas as pl
from jax.experimental.pallas import tpu as pltpu


# ----------------------------- Pallas kernel --------------------------------


def folded_residual_kernel(x_ref, t_ref, b_ref, o_ref):
    """o = relu(x @ T + b + x): one bf16 MXU matmul, f32 epilogue."""
    x = x_ref[...]                                           # (TR, WC) f32
    y = jnp.dot(x.astype(jnp.bfloat16), t_ref[...],
                preferred_element_type=jnp.float32)          # MXU, f32 accumulate
    o_ref[...] = jnp.maximum(y + b_ref[...] + x, 0.0).astype(o_ref.dtype)


# --------------------- host-side weight preparation --------------------------


def _toeplitz_block(w_kic, width, cin_total, cin_off, cout_total, cout_off):
    """Block-Toeplitz matrix of a 'same' zero-padded 1-D cross-correlation.

    Maps a position-major flattened input (width*cin_total,) to a
    position-major flattened output (width*cout_total,), writing only the
    given output-channel block.  w_kic: (k, cin, cout).
    """
    k, cin, cout = w_kic.shape
    pad = (k - 1) // 2
    w_np = np.asarray(jax.device_get(w_kic), dtype=np.float32)
    t_mat = np.zeros((width * cin_total, width * cout_total), np.float32)
    for v in range(width):          # output position
        for t in range(k):          # tap
            u = v + t - pad         # input position (cross-correlation)
            if 0 <= u < width:
                t_mat[u * cin_total + cin_off: u * cin_total + cin_off + cin,
                      v * cout_total + cout_off: v * cout_total + cout_off + cout] = w_np[t]
    return t_mat


def _tiled_bias(b_1c, width, cout_total, cout_off):
    """(1, cout) bias -> (1, width*cout_total) position-major row, block at cout_off."""
    b_np = np.asarray(jax.device_get(b_1c), np.float32).reshape(-1)
    row = np.zeros((1, width * cout_total), np.float32)
    for v in range(width):
        row[0, v * cout_total + cout_off: v * cout_total + cout_off + b_np.size] = b_np
    return row


def prepare_folded_params(params, cin, width, kernel_2, weight_dtype=jnp.bfloat16):
    """Fold the full InceptionBlock into (T, b): params = 7 (w, b) pairs.

    w: (k, Cin, Cout), b: (1, Cout).  Output channel order per position is
    [branch_pool, branch1_1, branch2_2, branch3_3] (the torch.cat order).
    """
    (w11, b11), (w21, b21), (w22, b22), (w31, b31), (w32, b32), (w33, b33), (wp, bp) = params
    out = w11.shape[2]
    c = 4 * out
    assert c == cin, "residual add requires out_ch == in_ch"
    wc = width * c

    # Last-stage maps emit straight into the concatenated output layout.
    t11 = _toeplitz_block(w11, width, cin, 0, c, out)        # x      -> branch1_1
    tp = _toeplitz_block(wp, width, cin, 0, c, 0)            # pooled -> branch_pool
    t22 = _toeplitz_block(w22, width, cin, 0, c, 2 * out)    # br2_1  -> branch2_2
    t33 = _toeplitz_block(w33, width, out, 0, c, 3 * out)    # br3_2  -> branch3_3
    # Intermediate maps.
    t21 = _toeplitz_block(w21, width, cin, 0, cin, 0)
    t31 = _toeplitz_block(w31, width, cin, 0, cin, 0)
    t32 = _toeplitz_block(w32, width, cin, 0, out, 0)
    pool_w = np.tile(np.eye(cin, dtype=np.float32)[None] / kernel_2, (kernel_2, 1, 1))
    tpool = _toeplitz_block(pool_w, width, cin, 0, cin, 0)   # count_include_pad avg-pool

    # Position-tiled bias rows.
    bb11 = _tiled_bias(b11, width, c, out)
    bbp = _tiled_bias(bp, width, c, 0)
    bb21 = _tiled_bias(b21, width, cin, 0)
    bb22 = _tiled_bias(b22, width, c, 2 * out)
    bb31 = _tiled_bias(b31, width, cin, 0)
    bb32 = _tiled_bias(b32, width, out, 0)
    bb33 = _tiled_bias(b33, width, c, 3 * out)

    # Full affine fold (valid: no nonlinearities inside the InceptionBlock).
    t_full = tpool @ tp + t11 + t21 @ t22 + t31 @ t32 @ t33
    b_full = (bbp + bb11
              + bb21 @ t22 + bb22
              + (bb31 @ t32 + bb32) @ t33 + bb33)

    # Lane-pad to a multiple of 128 so loads/stores stay unmasked.
    wc_pad = ((wc + 127) // 128) * 128
    if wc_pad != wc:
        t_full = np.pad(t_full, ((0, wc_pad - wc), (0, wc_pad - wc)))
        b_full = np.pad(b_full, ((0, 0), (0, wc_pad - wc)))

    return (jnp.asarray(t_full, weight_dtype),      # bf16 MXU operand
            jnp.asarray(b_full, jnp.float32))       # f32 epilogue bias


# ----------------------------- wrapper ---------------------------------------


def _forward(x_nchw, folded, single_buffer_weights):
    t_mat, b_row = folded
    n, c, h, w = x_nchw.shape
    r = n * h
    wc = w * c
    wc_pad = t_mat.shape[1]

    # NCHW -> (R, W*C): one independent, position-major row per (n, h).
    # TODO(synk): in a full network keep activations in this row/NHWC layout
    # end-to-end; each of these transposes is an extra HBM pass outside the
    # kernel.
    x_rows = jnp.transpose(x_nchw, (0, 2, 3, 1)).reshape(r, wc)
    if wc_pad != wc:
        x_rows = jnp.pad(x_rows, ((0, 0), (0, wc_pad - wc)))

    # Row tile: largest power of two <= 1024 giving >= 4 grid steps when R is
    # large; always force >= 2 grid steps (pipelining + both v7x TensorCores).
    tr = 1024
    while tr > 8 and pl.cdiv(r, tr) < 4:
        tr //= 2
    n_steps = max(pl.cdiv(r, tr), 2)
    r_pad = n_steps * tr
    if r_pad != r:
        x_rows = jnp.pad(x_rows, ((0, r_pad - r), (0, 0)))

    def row_map(i):
        return (i, 0)

    def const_map(i):
        return (0, 0)

    if single_buffer_weights:
        # Grid-invariant operands: single-buffer them (no per-step re-DMA).
        w_specs = [pl.BlockSpec(t_mat.shape, const_map, pipeline_mode=pl.Buffered(1)),
                   pl.BlockSpec(b_row.shape, const_map, pipeline_mode=pl.Buffered(1))]
    else:
        w_specs = [pl.BlockSpec(t_mat.shape, const_map),
                   pl.BlockSpec(b_row.shape, const_map)]

    # Explicit VMEM budget: weights (worst case 2 buffers) + double-buffered
    # x/out tiles + slack, clamped to a range that is safe on v5e/v6e/v7x.
    weight_bytes = 2 * (t_mat.size * t_mat.dtype.itemsize
                        + b_row.size * b_row.dtype.itemsize)
    io_bytes = 2 * tr * wc_pad * 2 * x_nchw.dtype.itemsize
    vmem_limit = int(min(max(weight_bytes + io_bytes + (4 << 20), 16 << 20), 64 << 20))

    out_rows = pl.pallas_call(
        folded_residual_kernel,
        grid=(r_pad // tr,),
        in_specs=[pl.BlockSpec((tr, wc_pad), row_map)] + w_specs,
        out_specs=pl.BlockSpec((tr, wc_pad), row_map),
        out_shape=jax.ShapeDtypeStruct((r_pad, wc_pad), x_nchw.dtype),
        compiler_params=pltpu.CompilerParams(
            dimension_semantics=("parallel",),
            vmem_limit_bytes=vmem_limit),
    )(x_rows, t_mat, b_row)

    out_rows = out_rows[:r, :wc]
    return jnp.transpose(out_rows.reshape(n, h, w, c), (0, 3, 1, 2))


def residual_block_forward(x_nchw, folded):
    try:
        out = _forward(x_nchw, folded, single_buffer_weights=True)
        return jax.block_until_ready(out)
    except Exception:
        # Safe fallback if this Pallas build rejects Buffered(1); post-fold the
        # double-buffered weights are only ~4*(W*C)^2 bytes anyway.
        out = _forward(x_nchw, folded, single_buffer_weights=False)
        return jax.block_until_ready(out)


# ----------------------------- pure-JAX reference ----------------------------


def _conv_ref(x_nchw, w_kic, b_1c):
    k = w_kic.shape[0]
    pad = (k - 1) // 2
    w_oihw = jnp.transpose(w_kic, (2, 1, 0))[:, :, None, :]  # (Cout, Cin, 1, k)
    y = jax.lax.conv_general_dilated(
        x_nchw, w_oihw, window_strides=(1, 1),
        padding=((0, 0), (pad, pad)),
        dimension_numbers=("NCHW", "OIHW", "NCHW"))
    return y + b_1c[0][None, :, None, None]


def _avg_pool_ref(x_nchw, k2):
    pad = (k2 - 1) // 2
    y = jax.lax.reduce_window(
        x_nchw, 0.0, jax.lax.add, (1, 1, 1, k2), (1, 1, 1, 1),
        ((0, 0), (0, 0), (0, 0), (pad, pad)))
    return y / k2  # count_include_pad=True (PyTorch default)


def residual_block_ref(x, params, kernel_2):
    (w11, b11), (w21, b21), (w22, b22), (w31, b31), (w32, b32), (w33, b33), (wp, bp) = params
    br11 = _conv_ref(x, w11, b11)
    br22 = _conv_ref(_conv_ref(x, w21, b21), w22, b22)
    br33 = _conv_ref(_conv_ref(_conv_ref(x, w31, b31), w32, b32), w33, b33)
    brp = _conv_ref(_avg_pool_ref(x, kernel_2), wp, bp)
    out = jnp.concatenate([brp, br11, br22, br33], axis=1)
    return jnp.maximum(out + x, 0.0)


# ----------------------------- main -------------------------------------------


def _init_conv(key, cin, cout, k):
    kw, kb = jax.random.split(key)
    bound = 1.0 / jnp.sqrt(cin * k)
    w = jax.random.uniform(kw, (k, cin, cout), jnp.float32, -bound, bound)
    b = jax.random.uniform(kb, (1, cout), jnp.float32, -bound, bound)
    return w, b


if __name__ == "__main__":
    # Residual add requires out_ch == in_ch, out_ch % 4 == 0; odd kernels.
    N, IN_CH, H, W = 2, 8, 4, 16
    OUT_CH = IN_CH
    K1, K2, K3 = 1, 3, 5
    OUT = OUT_CH // 4

    root = jax.random.PRNGKey(0)
    keys = jax.random.split(root, 8)
    x = jax.random.normal(keys[0], (N, IN_CH, H, W), jnp.float32)

    # (Cin, Cout, k) for: branch1_1, branch2_1, branch2_2, branch3_1,
    #                     branch3_2, branch3_3, branch_pool
    conv_defs = [
        (IN_CH, OUT, K1),
        (IN_CH, IN_CH, K1),
        (IN_CH, OUT, K3),
        (IN_CH, IN_CH, K1),
        (IN_CH, OUT, K2),
        (OUT, OUT, K2),
        (IN_CH, OUT, K1),
    ]
    params = [
        _init_conv(keys[i + 1], cin, cout, k)
        for i, (cin, cout, k) in enumerate(conv_defs)
    ]

    folded = prepare_folded_params(params, IN_CH, W, K2)

    out = residual_block_forward(x, folded)

    ref = residual_block_ref(x, params, K2)
    assert out.shape == (N, OUT_CH, H, W)
    max_err = float(jnp.max(jnp.abs(out - ref)))
    # bf16 Toeplitz weights (f32 accumulation / epilogue) -> slightly looser
    # tolerance than a pure-f32 pipeline.
    assert jnp.allclose(out, ref, rtol=3e-2, atol=3e-2), (
        "mismatch: max abs err = %g" % max_err
    )
    print("KERNEL_OK")
</pallas_src>

<mosaic_0001>
module attributes {stable_mosaic.version = 11 : i64} {
  func.func @folded_residual_kernel(%arg0: i32, %arg1: memref<8x128xf32, #tpu.memory_space<vmem>>, %arg2: memref<128x128xbf16, #tpu.memory_space<vmem>>, %arg3: memref<1x128xf32, #tpu.memory_space<vmem>>, %arg4: memref<8x128xf32, #tpu.memory_space<vmem>>) attributes {dimension_semantics = [#tpu.dimension_semantics<parallel>], iteration_bounds = array<i64: 2>, scalar_prefetch = 0 : i64, scratch_operands = 0 : i64, tpu.core_type = #tpu.core_type<tc>, window_params = [{transform_indices = @transform_0, window_bounds = array<i64: 8, 128>}, {pipeline_mode = #tpu.pipeline_mode<synchronous>, transform_indices = @transform_1, window_bounds = array<i64: 128, 128>}, {pipeline_mode = #tpu.pipeline_mode<synchronous>, transform_indices = @transform_2, window_bounds = array<i64: 1, 128>}, {transform_indices = @transform_3, window_bounds = array<i64: 8, 128>}]} {
    %c0 = arith.constant 0 : index
    %c0_0 = arith.constant 0 : index
    %0 = vector.load %arg1[%c0, %c0_0] : memref<8x128xf32, #tpu.memory_space<vmem>>, vector<8x128xf32>
    %1 = arith.truncf %0 : vector<8x128xf32> to vector<8x128xbf16>
    %c0_1 = arith.constant 0 : index
    %c0_2 = arith.constant 0 : index
    %2 = vector.load %arg2[%c0_1, %c0_2] : memref<128x128xbf16, #tpu.memory_space<vmem>>, vector<128x128xbf16>
    %cst = arith.constant dense<0.000000e+00> : vector<8x128xf32>
    %3 = tpu.matmul %1, %2, %cst {dimension_numbers = #tpu.dot_dimension_numbers<[1], [0], [0], [1], [0, 0, 1, 1], [], []>} : vector<8x128xbf16>, vector<128x128xbf16>, vector<8x128xf32> -> vector<8x128xf32>
    %c0_3 = arith.constant 0 : index
    %c0_4 = arith.constant 0 : index
    %4 = vector.load %arg3[%c0_3, %c0_4] : memref<1x128xf32, #tpu.memory_space<vmem>>, vector<1x128xf32>
    %5 = vector.broadcast %4 : vector<1x128xf32> to vector<8x128xf32>
    %6 = arith.addf %3, %5 : vector<8x128xf32>
    %7 = arith.addf %6, %0 : vector<8x128xf32>
    %cst_5 = arith.constant 0.000000e+00 : f32
    %8 = vector.broadcast %cst_5 : f32 to vector<8x128xf32>
    %9 = arith.maximumf %7, %8 : vector<8x128xf32>
    %c0_6 = arith.constant 0 : index
    %c0_7 = arith.constant 0 : index
    %10 = vector.load %arg4[%c0_6, %c0_7] : memref<8x128xf32, #tpu.memory_space<vmem>>, vector<8x128xf32>
    tpu.vector_store %arg4[%c0_6, %c0_7], %9 {strides = array<i32>} : memref<8x128xf32, #tpu.memory_space<vmem>>, vector<8x128xf32>,
    return
  }
  func.func @transform_0(%arg0: i32) -> (i32, i32) {
    %c0_i32 = arith.constant 0 : i32
    %c0_i32_0 = arith.constant 0 : i32
    return %arg0, %c0_i32 : i32, i32
  }
  func.func @transform_1(%arg0: i32) -> (i32, i32) {
    %c0_i32 = arith.constant 0 : i32
    %c0_i32_0 = arith.constant 0 : i32
    %c0_i32_1 = arith.constant 0 : i32
    return %c0_i32, %c0_i32_0 : i32, i32
  }
  func.func @transform_2(%arg0: i32) -> (i32, i32) {
    %c0_i32 = arith.constant 0 : i32
    %c0_i32_0 = arith.constant 0 : i32
    %c0_i32_1 = arith.constant 0 : i32
    return %c0_i32, %c0_i32_0 : i32, i32
  }
  func.func @transform_3(%arg0: i32) -> (i32, i32) {
    %c0_i32 = arith.constant 0 : i32
    %c0_i32_0 = arith.constant 0 : i32
    return %arg0, %c0_i32 : i32, i32
  }
}

module attributes {stable_mosaic.version = 11 : i64} {
  func.func @folded_residual_kernel(%arg0: i32, %arg1: memref<8x128xf32, #tpu.memory_space<vmem>>, %arg2: memref<128x128xbf16, #tpu.memory_space<vmem>>, %arg3: memref<1x128xf32, #tpu.memory_space<vmem>>, %arg4: memref<8x128xf32, #tpu.memory_space<vmem>>) attributes {dimension_semantics = [#tpu.dimension_semantics<parallel>], iteration_bounds = array<i64: 2>, scalar_prefetch = 0 : i64, scratch_operands = 0 : i64, tpu.core_type = #tpu.core_type<tc>, window_params = [{transform_indices = @transform_0, window_bounds = array<i64: 8, 128>}, {pipeline_mode = #tpu.pipeline_mode<synchronous>, transform_indices = @transform_1, window_bounds = array<i64: 128, 128>}, {pipeline_mode = #tpu.pipeline_mode<synchronous>, transform_indices = @transform_2, window_bounds = array<i64: 1, 128>}, {transform_indices = @transform_3, window_bounds = array<i64: 8, 128>}]} {
    %c0 = arith.constant 0 : index
    %c0_0 = arith.constant 0 : index
    %0 = vector.load %arg1[%c0, %c0_0] : memref<8x128xf32, #tpu.memory_space<vmem>>, vector<8x128xf32>
    %1 = arith.truncf %0 : vector<8x128xf32> to vector<8x128xbf16>
    %c0_1 = arith.constant 0 : index
    %c0_2 = arith.constant 0 : index
    %2 = vector.load %arg2[%c0_1, %c0_2] : memref<128x128xbf16, #tpu.memory_space<vmem>>, vector<128x128xbf16>
    %cst = arith.constant dense<0.000000e+00> : vector<8x128xf32>
    %3 = tpu.matmul %1, %2, %cst {dimension_numbers = #tpu.dot_dimension_numbers<[1], [0], [0], [1], [0, 0, 1, 1], [], []>} : vector<8x128xbf16>, vector<128x128xbf16>, vector<8x128xf32> -> vector<8x128xf32>
    %c0_3 = arith.constant 0 : index
    %c0_4 = arith.constant 0 : index
    %4 = vector.load %arg3[%c0_3, %c0_4] : memref<1x128xf32, #tpu.memory_space<vmem>>, vector<1x128xf32>
    %5 = vector.broadcast %4 : vector<1x128xf32> to vector<8x128xf32>
    %6 = arith.addf %3, %5 : vector<8x128xf32>
    %7 = arith.addf %6, %0 : vector<8x128xf32>
    %cst_5 = arith.constant 0.000000e+00 : f32
    %8 = vector.broadcast %cst_5 : f32 to vector<8x128xf32>
    %9 = arith.maximumf %7, %8 : vector<8x128xf32>
    %c0_6 = arith.constant 0 : index
    %c0_7 = arith.constant 0 : index
    %10 = vector.load %arg4[%c0_6, %c0_7] : memref<8x128xf32, #tpu.memory_space<vmem>>, vector<8x128xf32>
    tpu.vector_store %arg4[%c0_6, %c0_7], %9 {strides = array<i32>} : memref<8x128xf32, #tpu.memory_space<vmem>>, vector<8x128xf32>,
    return
  }
  func.func @transform_0(%arg0: i32) -> (i32, i32) {
    %c0_i32 = arith.constant 0 : i32
    %c0_i32_0 = arith.constant 0 : i32
    return %arg0, %c0_i32 : i32, i32
  }
  func.func @transform_1(%arg0: i32) -> (i32, i32) {
    %c0_i32 = arith.constant 0 : i32
    %c0_i32_0 = arith.constant 0 : i32
    %c0_i32_1 = arith.constant 0 : i32
    return %c0_i32, %c0_i32_0 : i32, i32
  }
  func.func @transform_2(%arg0: i32) -> (i32, i32) {
    %c0_i32 = arith.constant 0 : i32
    %c0_i32_0 = arith.constant 0 : i32
    %c0_i32_1 = arith.constant 0 : i32
    return %c0_i32, %c0_i32_0 : i32, i32
  }
  func.func @transform_3(%arg0: i32) -> (i32, i32) {
    %c0_i32 = arith.constant 0 : i32
    %c0_i32_0 = arith.constant 0 : i32
    return %arg0, %c0_i32 : i32, i32
  }
}

</mosaic_0001>

<bundles_post_ra>
// kernel: tpu_custom_call.1
= control target key start
LH: loop header
LB: loop body
LE: loop exit
PB: predicated region body
PF: predicated region fallthrough
CT: control target
= control target key end

     0   :  { %8 = vsyncpa [#allocation3], 0  ;;  %s893_s0 = inlined_call_operand.hbm [shape: f32[16,128], index: 0, kind: input, shape index: {}]   ;;  %s894_s1 = inlined_call_operand.hbm [shape: bf16[128,128], index: 1, kind: input, shape index: {}]   ;;  %s895_s2 = inlined_call_operand.vmem [shape: f32[1,128], index: 2, kind: input, shape index: {}]   ;;  %s896_s3 = inlined_call_operand.hbm [shape: f32[16,128], index: 3, kind: output, shape index: {}]  }
   0x1   :  { %10 = vsyncpa [#allocation3 + $0x1], 0 }
   0x2   :  { %11 = vsyncpa [#allocation6], 0 }
   0x3   :  { %12 = vsyncpa [#allocation4], 0 }
   0x4   :  { %14 = vsyncpa [#allocation4 + $0x1], 0  ;;  %s690_s12 = smov 0   ;;  %s692_s13 = smov 0  }
   0x5   :  { %s694_s14 = smov 0   ;;  %s696_s15 = smov 0  }
   0x6 LB: > { %s711_s16 = sadd.s32 4294967295, %s661_s15   ;;  %s412_s17 = sadd.s32 4294967294, %s661_s15   ;;  %s661_s15 = sphi %s696_s15, %s916_s15   ;;  %s657_s14 = sphi %s694_s14, %s915_s14   ;;  %s653_s13 = sphi %s692_s13, %s914_s13   ;;  %s649_s12 = sphi %s690_s12, %s913_s12  }
   0x7   : > { %p40_p0 = scmp.ne.s32.totalorder %s653_s13, %s649_s12  ;;  %p897_p1 = scmp.eq.s32.totalorder %s711_s16, 0 }
   0x8   : > { %p112_p3 = scmp.eq.s32.totalorder %s412_s17, 1  ;;  %p413_p5 = scmp.ge.s32.totalorder %s661_s15, 1 }
   0x9   : > { %p720_p4 = por %p897_p1, %p40_p0  ;;  %p119_p7 = scmp.lt.s32.totalorder %s661_s15, 3 }
   0xa   : > { %p725_p6 = por %p112_p3, %p40_p0  ;;  %s663_s21 = smov [#allocation5]  }
   0xb   : > { %s900_s18 = scalar_select %p720_p4, 1, 0 }
   0xc   : > { %s901_s19 = scalar_select %p725_p6, 1, 0 }
   0xd   : > { %p730_p8 = pnand %p413_p5, %p119_p7  ;;  %s131_s22 = sshll.u32 %s663_s21, 4  ;;  %s734_s22 = int_to_ptr.vmem [resolvable:$true] %s131_s22 }
   0xe   : > { %s746_s24 = sadd.s32 1, %s661_s15   ;;  %s27_s25 = sadd.s32 1, %s657_s14 }
   0xf   : > { %s902_s20 = scalar_select %p730_p8, 1, 0 }
  0x10   : > { %p472_p9 = pneg %p730_p8  ;;  %s24_s26 = ssub.s32 %s661_s15, %s746_s24 }
  0x11   : > { %s533_s29 = scalar_lea.hbm %s894_s1, 1024 }
  0x12   : > { %p741_p11 = pnand %p472_p9, %p897_p1  ;;  %p534_p12 = scmp.ne.s32.totalorder %s894_s1, %s533_s29 }
  0x13   : > { %p540_p5 = scmp.lt.u32.totalorder %s533_s29, %s894_s1 }
  0x14   : > { %p535_p13 = pneg %p741_p11 }
  0x16   : > { %p536_p0 = pnand %p535_p13, %p534_p12 }
  0x18   : > { %p537_p3 = pneg %p536_p0 }
  0x1a   : > { %p542_p7 = pnand %p540_p5, %p537_p3 }
  0x1c   : > { %545 = shalt.err (!%p542_p7)
}
  0x1d   : > { %s546_s7 = scalar_lea.vmem %s734_s22, 1024  ;;  %p554_p2 = scmp.lt.s32.totalorder %s734_s22, %s734_s22 }
  0x1e   : > { %p547_p9 = scmp.ne.s32.totalorder %s734_s22, %s546_s7  ;;  %p555_p6 = scmp.lt.s32.totalorder %s546_s7, %s546_s7 }
  0x20   : > { %p549_p10 = pnand %p547_p9, %p535_p13  ;;  %p556_p4 = por %p555_p6, %p554_p2 }
  0x22   : > { %p550_p1 = pneg %p549_p10 }
  0x24   : > { %p557_p8 = pnand %p556_p4, %p550_p1 }
  0x26   : > { %560 = shalt.err (!%p557_p8)
}
  0x27   : > { %s664_s8 = smov 64   ;;  %s665_s9 = smov 4  }
  0x28   : > { %475 = dma.hbm_to_vmem [thread:$0]  (!%p741_p11), %s894_s1, 1024, %s734_s22, [#allocation6], %s664_s8, %s664_s8, %s665_s9  }
  0x29   : > { %p25_p2 = scmp.eq.s32.totalorder %s24_s26, 0  ;;  %p34_p1 = scmp.ne.s32.totalorder %s657_s14, %s653_s13 }
  0x2a   : > { %p35_p4 = scmp.eq.s32.totalorder %s661_s15, 0  ;;  %p485_p6 = scmp.lt.s32.totalorder %s661_s15, 2 }
  0x2b   : > { %s777_s17 = scalar_select %p25_p2, %s657_s14, %s27_s25  }
  0x2c   : > { %p36_p8 = por %p35_p4, %p34_p1  ;;  %p904_p10 = scmp.eq.s32.totalorder %s711_s16, 1 }
  0x2d   : > { %s148_s27 = sand.u32 1, %s657_s14   ;;  %s417_s28 = sshll.u32 %s661_s15, 7 }
  0x2e   : > { %p781_p12 = por %p904_p10, %p34_p1  ;;  %s416_s29 = sshll.u32 %s148_s27, 3 }
  0x2f   : > { %s790_s4 = scalar_lea.hbm %s893_s0, %s417_s28  ;;  %s152_s22 = scalar_lea.vmem [#allocation2], %s416_s29 }
  0x30   : > { %s159_s25 = sshll.u32 %s152_s22, 4  ;;  %p792_p11 = pnand %p485_p6, %p36_p8  ;;  %s796_s25 = int_to_ptr.vmem [resolvable:$true] %s159_s25 }
  0x31   : > { %s149_s5 = scalar_lea.sflag [#allocation3], %s148_s27  ;;  %s561_s6 = scalar_lea.hbm %s790_s4, 128 }
  0x32   : > { %p562_p13 = scmp.ne.s32.totalorder %s790_s4, %s561_s6  ;;  %p563_p0 = pneg %p792_p11 }
  0x33   : > { %s566_s9 = scalar_lea.hbm %s893_s0, 256  ;;  %p567_p7 = scmp.lt.u32.totalorder %s790_s4, %s893_s0 }
  0x34   : > { %p564_p3 = pnand %p563_p0, %p562_p13  ;;  %p568_p9 = scmp.lt.u32.totalorder %s566_s9, %s561_s6 }
  0x35   : > { %p570_p1 = scmp.lt.u32.totalorder %s561_s6, %s790_s4 }
  0x36   : > { %p565_p5 = pneg %p564_p3  ;;  %p569_p2 = por %p568_p9, %p567_p7 }
  0x38   : > { %p571_p4 = por %p570_p1, %p569_p2 }
  0x3a   : > { %p572_p6 = pnand %p571_p4, %p565_p5 }
  0x3c   : > { %575 = shalt.err (!%p572_p6)
}
  0x3d   : > { %s576_s27 = scalar_lea.vmem %s796_s25, 128  ;;  %s666_s28 = smov [#allocation2]  }
  0x3e   : > { %p577_p8 = scmp.ne.s32.totalorder %s796_s25, %s576_s27  ;;  %s581_s29 = sshll.u32 %s666_s28, 4  ;;  %s582_s29 = int_to_ptr.vmem [resolvable:$false] %s581_s29 }
  0x3f   : > { %s583_s23 = scalar_lea.vmem %s582_s29, 256  ;;  %p584_p3 = scmp.lt.s32.totalorder %s796_s25, %s582_s29 }
  0x40   : > { %p579_p10 = pnand %p577_p8, %p563_p0  ;;  %p585_p7 = scmp.lt.s32.totalorder %s583_s23, %s576_s27 }
  0x42   : > { %p580_p13 = pneg %p579_p10  ;;  %p586_p9 = por %p585_p7, %p584_p3 }
  0x44   : > { %p587_p2 = pnand %p586_p9, %p580_p13 }
  0x46   : > { %590 = shalt.err (!%p587_p2)
}
  0x47   : > { %479 = dma.hbm_to_vmem [thread:$0]  (!%p792_p11), %s790_s4, 128, %s796_s25, %s149_s5  }
  0x48   : > { %p907_p5 = scmp.ne.s32.totalorder %s902_s20, 0 }
  0x49   : > { %s826_s30 = sand.u32 (!%p907_p5), 1, %s653_s13   ;;  %p908_p0 = scmp.ne.s32.totalorder (!%p907_p5), %s900_s18, 0 }
  0x4a   : > { %168 = sbr.rel (%p907_p5) target bundleno = 350 (0x15e), region = 32  ;;  %s419_s22 = sshll.u32 (!%p907_p5), %s826_s30, 3 }
  0x4b   : > { %s171_s6 = scalar_lea.sflag (!%p907_p5), [#allocation3], %s826_s30  ;;  %s174_s7 = scalar_lea.vmem (!%p907_p5), [#allocation2], %s419_s22 }
  0x51   : > { %636 = dma.done.wait (%p908_p0), %s171_s6, 128  }
  0x52   : > { %638 = vsyncadd (%p908_p0), %s171_s6, 4294967168  ;;  %p909_p11 = scmp.eq.s32.totalorder %s711_s16, 0 }
  0x54   : > { %640 = dma.done.wait (%p909_p11), [#allocation6], 1024   ;;  %p910_p1 = pmov %p909_p11 }
  0x55   : > { %v667_v0 = vmov 0.0   ;;  %vm668_vm0 = vmmov 0   ;;  %v525_v1 = vld [vmem:[#allocation5] sm:$0xff]   ;;  %v526_v2 = vld [vmem:[#allocation5 + $0x8] sm:$0xff]   ;;  %v527_v3 = vld [vmem:[#allocation5 + $0x10] sm:$0xff]   ;;  %s432_s4 = sshll.u32 %s711_s16, 7 }
  0x56   : > { %642 = vsyncadd (%p910_p1), [#allocation6], 4294966272  ;;  %444 = vmatprep.subr.bf16.mxu0 %v667_v0  ;;  %460 = vmatprep.mubr.msk.bf16.mxu0 %vm668_vm0, %v667_v0  ;;  %v528_v4 = vld [vmem:[#allocation5 + $0x18] sm:$0xff]   ;;  %v529_v5 = vld [vmem:[#allocation5 + $0x20] sm:$0xff]   ;;  %s200_s25 = scalar_lea.vmem [#allocation7], %s419_s22  ;;  %s849_s9 = scalar_lea.hbm %s896_s3, %s432_s4 }
  0x57   : > { %445 = vmatpush3.bf16.msra.mxu0 %v525_v1  ;;  %v530_v6 = vld [vmem:[#allocation5 + $0x28] sm:$0xff]   ;;  %v531_v7 = vld [vmem:[#allocation5 + $0x30] sm:$0xff]   ;;  %v532_v8 = vld [vmem:[#allocation5 + $0x38] sm:$0xff]   ;;  %s332_s26 = sshll.u32 %s200_s25, 4  ;;  %s319_s10 = scalar_lea.sflag [#allocation4], %s826_s30  ;;  %s851_s26 = int_to_ptr.vmem [resolvable:$true] %s332_s26 }
  0x58   : > { %446 = vmatprep.subr.bf16.mxu0 %v667_v0  ;;  %v202_v9 = vld [vmem:[%s174_s7] sm:$0xff]  ;;  %s591_s11 = scalar_lea.vmem %s851_s26, 128  ;;  %s669_s16 = smov [#allocation7]  }
  0x59   : > { %v203_v10 = vpack.c.bf16 %v202_v9, %v202_v9  ;;  %v422_v11 = vld [vmem:[%s895_s2] ss:$0 sm:$0xff]  ;;  %p592_p4 = scmp.ne.s32.totalorder %s851_s26, %s591_s11  ;;  %s595_s27 = sshll.u32 %s669_s16, 4  ;;  %s596_s27 = int_to_ptr.vmem [resolvable:$false] %s595_s27 }
  0x5a   : > { %s597_s28 = scalar_lea.vmem %s596_s27, 256  ;;  %p598_p10 = scmp.lt.s32.totalorder %s851_s26, %s596_s27 }
  0x5b   : > { %447 = vmatpush3.bf16.msra.mxu0 %v526_v2  ;;  %p593_p6 = pnand %p592_p4, %p781_p12  ;;  %p599_p13 = scmp.lt.s32.totalorder %s597_s28, %s591_s11 }
  0x5c   : > { %448 = vmatprep.subr.bf16.mxu0 %v667_v0 }
  0x5d   : > { %p594_p8 = pneg %p593_p6  ;;  %p600_p3 = por %p599_p13, %p598_p10 }
  0x5f   : > { %449 = vmatpush3.bf16.msra.mxu0 %v527_v3  ;;  %p601_p7 = pnand %p600_p3, %p594_p8 }
  0x60   : > { %450 = vmatprep.subr.bf16.mxu0 %v667_v0 }
  0x63   : > { %451 = vmatpush3.bf16.msra.mxu0 %v528_v4 }
  0x64   : > { %452 = vmatprep.subr.bf16.mxu0 %v667_v0 }
  0x67   : > { %453 = vmatpush3.bf16.msra.mxu0 %v529_v5 }
  0x68   : > { %454 = vmatprep.subr.bf16.mxu0 %v667_v0 }
  0x6b   : > { %455 = vmatpush3.bf16.msra.mxu0 %v530_v6 }
  0x6c   : > { %456 = vmatprep.subr.bf16.mxu0 %v667_v0 }
  0x6f   : > { %457 = vmatpush3.bf16.msra.mxu0 %v531_v7 }
  0x70   : > { %458 = vmatprep.subr.bf16.mxu0 %v667_v0 }
  0x73   : > { %459 = vmatpush3.bf16.msra.mxu0 %v532_v8 }
  0x76   : > { %461 = vmatmul.mubr.bf16.vlgmr.msra.gmra.mrb[0].mxu0 %v203_v10 }
 0x149   : > { %v309_v12 = vpop.f32.mrb[0].mxu0 }
 0x14a   : > { %v310_v13 = vadd.f32 %v422_v11, %v309_v12  ;;  %v462_v14 = vpop.f32.mrb[1].mxu0 }
 0x14b   : > { %v312_v15 = vpop.f32.mrb[2].mxu0 }
 0x14c   : > { %v315_v16 = vadd.f32 %v310_v13, %v202_v9  ;;  %v463_v17 = vpop.f32.mrb[3].mxu0 }
 0x14e   : > { %v316_v18 = vmax.f32 %v315_v16, 0.0 }
 0x150   : > { %317 = vst [vmem:[%s200_s25] sm:$0xff] %v316_v18 }
 0x151   : > { %604 = shalt.err (!%p601_p7)
}
 0x152   : > { %s605_s29 = scalar_lea.hbm %s849_s9, 128  ;;  %s609_s22 = scalar_lea.hbm %s896_s3, 256 }
 0x153   : > { %p606_p9 = scmp.ne.s32.totalorder %s849_s9, %s605_s29  ;;  %p610_p0 = scmp.lt.u32.totalorder %s849_s9, %s896_s3 }
 0x154   : > { %p611_p11 = scmp.lt.u32.totalorder %s609_s22, %s605_s29  ;;  %p613_p4 = scmp.lt.u32.totalorder %s605_s29, %s849_s9 }
 0x155   : > { %p607_p2 = pnand %p606_p9, %p781_p12 }
 0x156   : > { %p612_p1 = por %p611_p11, %p610_p0 }
 0x157   : > { %p608_p5 = pneg %p607_p2 }
 0x158   : > { %p614_p6 = por %p613_p4, %p612_p1 }
 0x15a   : > { %p615_p8 = pnand %p614_p6, %p608_p5 }
 0x15c   : > { %618 = shalt.err (!%p615_p8)
}
 0x15d   : > { %470 = dma.vmem_to_hbm [thread:$0]  (%p781_p12), %s851_s26, 128, %s849_s9, %s319_s10  }
 0x15e PF: > { %s344_s18 = sand.u32 1, %s649_s12   ;;  %p911_p10 = scmp.ne.s32.totalorder %s901_s19, 0 }
 0x15f   : > { %p912_p13 = scmp.ge.s32.totalorder %s661_s15, 2  ;;  %s345_s20 = scalar_lea.sflag [#allocation4], %s344_s18 }
 0x161   : > { %p481_p3 = pnand %p912_p13, %p911_p10 }
 0x163   : > { %644 = dma.done.wait (!%p481_p3), %s345_s20, 128  }
 0x164   : > { %646 = vsyncadd (!%p481_p3), %s345_s20, 4294967168  ;;  %p17_p7 = scmp.ge.s32.totalorder %s746_s24, 4   ;;  %s913_s12 = smov %s653_s13 }
 0x165   : > { %s914_s13 = smov %s657_s14  ;;  %s915_s14 = smov %s777_s17 }
 0x166   : > { %s916_s15 = smov %s746_s24  ;;  %19 = sbr.rel (!%p17_p7) target bundleno = 6 (0x6), region = 81 }
 0x16d   :  { %350 = vsyncpa [#allocation3], 1 }
 0x16e   :  { %352 = vsyncpa [#allocation3 + $0x1], 1 }
 0x16f   :  { %353 = vsyncpa [#allocation6], 1 }
 0x170   :  { %354 = vsyncpa [#allocation4], 1 }
 0x171   :  { %356 = vsyncpa [#allocation4 + $0x1], 1 }

// kernel: tpu_custom_call.1
= control target key start
LH: loop header
LB: loop body
LE: loop exit
PB: predicated region body
PF: predicated region fallthrough
CT: control target
= control target key end

     0   :  { %8 = vsyncpa [#allocation3], 0  ;;  %s893_s0 = inlined_call_operand.hbm [shape: f32[16,128], index: 0, kind: input, shape index: {}]   ;;  %s894_s1 = inlined_call_operand.hbm [shape: bf16[128,128], index: 1, kind: input, shape index: {}]   ;;  %s895_s2 = inlined_call_operand.vmem [shape: f32[1,128], index: 2, kind: input, shape index: {}]   ;;  %s896_s3 = inlined_call_operand.hbm [shape: f32[16,128], index: 3, kind: output, shape index: {}]  }
   0x1   :  { %10 = vsyncpa [#allocation3 + $0x1], 0 }
   0x2   :  { %11 = vsyncpa [#allocation6], 0 }
   0x3   :  { %12 = vsyncpa [#allocation4], 0 }
   0x4   :  { %14 = vsyncpa [#allocation4 + $0x1], 0  ;;  %s690_s12 = smov 0   ;;  %s692_s13 = smov 0  }
   0x5   :  { %s694_s14 = smov 0   ;;  %s696_s15 = smov 0  }
   0x6 LB: > { %s711_s16 = sadd.s32 4294967295, %s661_s15   ;;  %s412_s17 = sadd.s32 4294967294, %s661_s15   ;;  %s661_s15 = sphi %s696_s15, %s916_s15   ;;  %s657_s14 = sphi %s694_s14, %s915_s14   ;;  %s653_s13 = sphi %s692_s13, %s914_s13   ;;  %s649_s12 = sphi %s690_s12, %s913_s12  }
   0x7   : > { %p40_p0 = scmp.ne.s32.totalorder %s653_s13, %s649_s12  ;;  %p897_p1 = scmp.eq.s32.totalorder %s711_s16, 0 }
   0x8   : > { %p112_p3 = scmp.eq.s32.totalorder %s412_s17, 1  ;;  %p413_p5 = scmp.ge.s32.totalorder %s661_s15, 1 }
   0x9   : > { %p720_p4 = por %p897_p1, %p40_p0  ;;  %p119_p7 = scmp.lt.s32.totalorder %s661_s15, 3 }
   0xa   : > { %p725_p6 = por %p112_p3, %p40_p0  ;;  %s663_s21 = smov [#allocation5]  }
   0xb   : > { %s900_s18 = scalar_select %p720_p4, 1, 0 }
   0xc   : > { %s901_s19 = scalar_select %p725_p6, 1, 0 }
   0xd   : > { %p730_p8 = pnand %p413_p5, %p119_p7  ;;  %s131_s22 = sshll.u32 %s663_s21, 4  ;;  %s734_s22 = int_to_ptr.vmem [resolvable:$true] %s131_s22 }
   0xe   : > { %s746_s24 = sadd.s32 1, %s661_s15   ;;  %s27_s25 = sadd.s32 1, %s657_s14 }
   0xf   : > { %s902_s20 = scalar_select %p730_p8, 1, 0 }
  0x10   : > { %p472_p9 = pneg %p730_p8  ;;  %s24_s26 = ssub.s32 %s661_s15, %s746_s24 }
  0x11   : > { %s533_s29 = scalar_lea.hbm %s894_s1, 1024 }
  0x12   : > { %p741_p11 = pnand %p472_p9, %p897_p1  ;;  %p534_p12 = scmp.ne.s32.totalorder %s894_s1, %s533_s29 }
  0x13   : > { %p540_p5 = scmp.lt.u32.totalorder %s533_s29, %s894_s1 }
  0x14   : > { %p535_p13 = pneg %p741_p11 }
  0x16   : > { %p536_p0 = pnand %p535_p13, %p534_p12 }
  0x18   : > { %p537_p3 = pneg %p536_p0 }
  0x1a   : > { %p542_p7 = pnand %p540_p5, %p537_p3 }
  0x1c   : > { %545 = shalt.err (!%p542_p7)
}
  0x1d   : > { %s546_s7 = scalar_lea.vmem %s734_s22, 1024  ;;  %p554_p2 = scmp.lt.s32.totalorder %s734_s22, %s734_s22 }
  0x1e   : > { %p547_p9 = scmp.ne.s32.totalorder %s734_s22, %s546_s7  ;;  %p555_p6 = scmp.lt.s32.totalorder %s546_s7, %s546_s7 }
  0x20   : > { %p549_p10 = pnand %p547_p9, %p535_p13  ;;  %p556_p4 = por %p555_p6, %p554_p2 }
  0x22   : > { %p550_p1 = pneg %p549_p10 }
  0x24   : > { %p557_p8 = pnand %p556_p4, %p550_p1 }
  0x26   : > { %560 = shalt.err (!%p557_p8)
}
  0x27   : > { %s664_s8 = smov 64   ;;  %s665_s9 = smov 4  }
  0x28   : > { %475 = dma.hbm_to_vmem [thread:$0]  (!%p741_p11), %s894_s1, 1024, %s734_s22, [#allocation6], %s664_s8, %s664_s8, %s665_s9  }
  0x29   : > { %p25_p2 = scmp.eq.s32.totalorder %s24_s26, 0  ;;  %p34_p1 = scmp.ne.s32.totalorder %s657_s14, %s653_s13 }
  0x2a   : > { %p35_p4 = scmp.eq.s32.totalorder %s661_s15, 0  ;;  %p485_p6 = scmp.lt.s32.totalorder %s661_s15, 2 }
  0x2b   : > { %s777_s17 = scalar_select %p25_p2, %s657_s14, %s27_s25  }
  0x2c   : > { %p36_p8 = por %p35_p4, %p34_p1  ;;  %p904_p10 = scmp.eq.s32.totalorder %s711_s16, 1 }
  0x2d   : > { %s148_s27 = sand.u32 1, %s657_s14   ;;  %s417_s28 = sshll.u32 %s661_s15, 7 }
  0x2e   : > { %p781_p12 = por %p904_p10, %p34_p1  ;;  %s416_s29 = sshll.u32 %s148_s27, 3 }
  0x2f   : > { %s790_s4 = scalar_lea.hbm %s893_s0, %s417_s28  ;;  %s152_s22 = scalar_lea.vmem [#allocation2], %s416_s29 }
  0x30   : > { %s159_s25 = sshll.u32 %s152_s22, 4  ;;  %p792_p11 = pnand %p485_p6, %p36_p8  ;;  %s796_s25 = int_to_ptr.vmem [resolvable:$true] %s159_s25 }
  0x31   : > { %s149_s5 = scalar_lea.sflag [#allocation3], %s148_s27  ;;  %s561_s6 = scalar_lea.hbm %s790_s4, 128 }
  0x32   : > { %p562_p13 = scmp.ne.s32.totalorder %s790_s4, %s561_s6  ;;  %p563_p0 = pneg %p792_p11 }
  0x33   : > { %s566_s9 = scalar_lea.hbm %s893_s0, 256  ;;  %p567_p7 = scmp.lt.u32.totalorder %s790_s4, %s893_s0 }
  0x34   : > { %p564_p3 = pnand %p563_p0, %p562_p13  ;;  %p568_p9 = scmp.lt.u32.totalorder %s566_s9, %s561_s6 }
  0x35   : > { %p570_p1 = scmp.lt.u32.totalorder %s561_s6, %s790_s4 }
  0x36   : > { %p565_p5 = pneg %p564_p3  ;;  %p569_p2 = por %p568_p9, %p567_p7 }
  0x38   : > { %p571_p4 = por %p570_p1, %p569_p2 }
  0x3a   : > { %p572_p6 = pnand %p571_p4, %p565_p5 }
  0x3c   : > { %575 = shalt.err (!%p572_p6)
}
  0x3d   : > { %s576_s27 = scalar_lea.vmem %s796_s25, 128  ;;  %s666_s28 = smov [#allocation2]  }
  0x3e   : > { %p577_p8 = scmp.ne.s32.totalorder %s796_s25, %s576_s27  ;;  %s581_s29 = sshll.u32 %s666_s28, 4  ;;  %s582_s29 = int_to_ptr.vmem [resolvable:$false] %s581_s29 }
  0x3f   : > { %s583_s23 = scalar_lea.vmem %s582_s29, 256  ;;  %p584_p3 = scmp.lt.s32.totalorder %s796_s25, %s582_s29 }
  0x40   : > { %p579_p10 = pnand %p577_p8, %p563_p0  ;;  %p585_p7 = scmp.lt.s32.totalorder %s583_s23, %s576_s27 }
  0x42   : > { %p580_p13 = pneg %p579_p10  ;;  %p586_p9 = por %p585_p7, %p584_p3 }
  0x44   : > { %p587_p2 = pnand %p586_p9, %p580_p13 }
  0x46   : > { %590 = shalt.err (!%p587_p2)
}
  0x47   : > { %479 = dma.hbm_to_vmem [thread:$0]  (!%p792_p11), %s790_s4, 128, %s796_s25, %s149_s5  }
  0x48   : > { %p907_p5 = scmp.ne.s32.totalorder %s902_s20, 0 }
  0x49   : > { %s826_s30 = sand.u32 (!%p907_p5), 1, %s653_s13   ;;  %p908_p0 = scmp.ne.s32.totalorder (!%p907_p5), %s900_s18, 0 }
  0x4a   : > { %168 = sbr.rel (%p907_p5) target bundleno = 350 (0x15e), region = 32  ;;  %s419_s22 = sshll.u32 (!%p907_p5), %s826_s30, 3 }
  0x4b   : > { %s171_s6 = scalar_lea.sflag (!%p907_p5), [#allocation3], %s826_s30  ;;  %s174_s7 = scalar_lea.vmem (!%p907_p5), [#allocation2], %s419_s22 }
  0x51   : > { %636 = dma.done.wait (%p908_p0), %s171_s6, 128  }
  0x52   : > { %638 = vsyncadd (%p908_p0), %s171_s6, 4294967168  ;;  %p909_p11 = scmp.eq.s32.totalorder %s711_s16, 0 }
  0x54   : > { %640 = dma.done.wait (%p909_p11), [#allocation6], 1024   ;;  %p910_p1 = pmov %p909_p11 }
  0x55   : > { %v667_v0 = vmov 0.0   ;;  %vm668_vm0 = vmmov 0   ;;  %v525_v1 = vld [vmem:[#allocation5] sm:$0xff]   ;;  %v526_v2 = vld [vmem:[#allocation5 + $0x8] sm:$0xff]   ;;  %v527_v3 = vld [vmem:[#allocation5 + $0x10] sm:$0xff]   ;;  %s432_s4 = sshll.u32 %s711_s16, 7 }
  0x56   : > { %642 = vsyncadd (%p910_p1), [#allocation6], 4294966272  ;;  %444 = vmatprep.subr.bf16.mxu0 %v667_v0  ;;  %460 = vmatprep.mubr.msk.bf16.mxu0 %vm668_vm0, %v667_v0  ;;  %v528_v4 = vld [vmem:[#allocation5 + $0x18] sm:$0xff]   ;;  %v529_v5 = vld [vmem:[#allocation5 + $0x20] sm:$0xff]   ;;  %s200_s25 = scalar_lea.vmem [#allocation7], %s419_s22  ;;  %s849_s9 = scalar_lea.hbm %s896_s3, %s432_s4 }
  0x57   : > { %445 = vmatpush3.bf16.msra.mxu0 %v525_v1  ;;  %v530_v6 = vld [vmem:[#allocation5 + $0x28] sm:$0xff]   ;;  %v531_v7 = vld [vmem:[#allocation5 + $0x30] sm:$0xff]   ;;  %v532_v8 = vld [vmem:[#allocation5 + $0x38] sm:$0xff]   ;;  %s332_s26 = sshll.u32 %s200_s25, 4  ;;  %s319_s10 = scalar_lea.sflag [#allocation4], %s826_s30  ;;  %s851_s26 = int_to_ptr.vmem [resolvable:$true] %s332_s26 }
  0x58   : > { %446 = vmatprep.subr.bf16.mxu0 %v667_v0  ;;  %v202_v9 = vld [vmem:[%s174_s7] sm:$0xff]  ;;  %s591_s11 = scalar_lea.vmem %s851_s26, 128  ;;  %s669_s16 = smov [#allocation7]  }
  0x59   : > { %v203_v10 = vpack.c.bf16 %v202_v9, %v202_v9  ;;  %v422_v11 = vld [vmem:[%s895_s2] ss:$0 sm:$0xff]  ;;  %p592_p4 = scmp.ne.s32.totalorder %s851_s26, %s591_s11  ;;  %s595_s27 = sshll.u32 %s669_s16, 4  ;;  %s596_s27 = int_to_ptr.vmem [resolvable:$false] %s595_s27 }
  0x5a   : > { %s597_s28 = scalar_lea.vmem %s596_s27, 256  ;;  %p598_p10 = scmp.lt.s32.totalorder %s851_s26, %s596_s27 }
  0x5b   : > { %447 = vmatpush3.bf16.msra.mxu0 %v526_v2  ;;  %p593_p6 = pnand %p592_p4, %p781_p12  ;;  %p599_p13 = scmp.lt.s32.totalorder %s597_s28, %s591_s11 }
  0x5c   : > { %448 = vmatprep.subr.bf16.mxu0 %v667_v0 }
  0x5d   : > { %p594_p8 = pneg %p593_p6  ;;  %p600_p3 = por %p599_p13, %p598_p10 }
  0x5f   : > { %449 = vmatpush3.bf16.msra.mxu0 %v527_v3  ;;  %p601_p7 = pnand %p600_p3, %p594_p8 }
  0x60   : > { %450 = vmatprep.subr.bf16.mxu0 %v667_v0 }
  0x63   : > { %451 = vmatpush3.bf16.msra.mxu0 %v528_v4 }
  0x64   : > { %452 = vmatprep.subr.bf16.mxu0 %v667_v0 }
  0x67   : > { %453 = vmatpush3.bf16.msra.mxu0 %v529_v5 }
  0x68   : > { %454 = vmatprep.subr.bf16.mxu0 %v667_v0 }
  0x6b   : > { %455 = vmatpush3.bf16.msra.mxu0 %v530_v6 }
  0x6c   : > { %456 = vmatprep.subr.bf16.mxu0 %v667_v0 }
  0x6f   : > { %457 = vmatpush3.bf16.msra.mxu0 %v531_v7 }
  0x70   : > { %458 = vmatprep.subr.bf16.mxu0 %v667_v0 }
  0x73   : > { %459 = vmatpush3.bf16.msra.mxu0 %v532_v8 }
  0x76   : > { %461 = vmatmul.mubr.bf16.vlgmr.msra.gmra.mrb[0].mxu0 %v203_v10 }
 0x149   : > { %v309_v12 = vpop.f32.mrb[0].mxu0 }
 0x14a   : > { %v310_v13 = vadd.f32 %v422_v11, %v309_v12  ;;  %v462_v14 = vpop.f32.mrb[1].mxu0 }
 0x14b   : > { %v312_v15 = vpop.f32.mrb[2].mxu0 }
 0x14c   : > { %v315_v16 = vadd.f32 %v310_v13, %v202_v9  ;;  %v463_v17 = vpop.f32.mrb[3].mxu0 }
 0x14e   : > { %v316_v18 = vmax.f32 %v315_v16, 0.0 }
 0x150   : > { %317 = vst [vmem:[%s200_s25] sm:$0xff] %v316_v18 }
 0x151   : > { %604 = shalt.err (!%p601_p7)
}
 0x152   : > { %s605_s29 = scalar_lea.hbm %s849_s9, 128  ;;  %s609_s22 = scalar_lea.hbm %s896_s3, 256 }
 0x153   : > { %p606_p9 = scmp.ne.s32.totalorder %s849_s9, %s605_s29  ;;  %p610_p0 = scmp.lt.u32.totalorder %s849_s9, %s896_s3 }
 0x154   : > { %p611_p11 = scmp.lt.u32.totalorder %s609_s22, %s605_s29  ;;  %p613_p4 = scmp.lt.u32.totalorder %s605_s29, %s849_s9 }
 0x155   : > { %p607_p2 = pnand %p606_p9, %p781_p12 }
 0x156   : > { %p612_p1 = por %p611_p11, %p610_p0 }
 0x157   : > { %p608_p5 = pneg %p607_p2 }
 0x158   : > { %p614_p6 = por %p613_p4, %p612_p1 }
 0x15a   : > { %p615_p8 = pnand %p614_p6, %p608_p5 }
 0x15c   : > { %618 = shalt.err (!%p615_p8)
}
 0x15d   : > { %470 = dma.vmem_to_hbm [thread:$0]  (%p781_p12), %s851_s26, 128, %s849_s9, %s319_s10  }
 0x15e PF: > { %s344_s18 = sand.u32 1, %s649_s12   ;;  %p911_p10 = scmp.ne.s32.totalorder %s901_s19, 0 }
 0x15f   : > { %p912_p13 = scmp.ge.s32.totalorder %s661_s15, 2  ;;  %s345_s20 = scalar_lea.sflag [#allocation4], %s344_s18 }
 0x161   : > { %p481_p3 = pnand %p912_p13, %p911_p10 }
 0x163   : > { %644 = dma.done.wait (!%p481_p3), %s345_s20, 128  }
 0x164   : > { %646 = vsyncadd (!%p481_p3), %s345_s20, 4294967168  ;;  %p17_p7 = scmp.ge.s32.totalorder %s746_s24, 4   ;;  %s913_s12 = smov %s653_s13 }
 0x165   : > { %s914_s13 = smov %s657_s14  ;;  %s915_s14 = smov %s777_s17 }
 0x166   : > { %s916_s15 = smov %s746_s24  ;;  %19 = sbr.rel (!%p17_p7) target bundleno = 6 (0x6), region = 81 }
 0x16d   :  { %350 = vsyncpa [#allocation3], 1 }
 0x16e   :  { %352 = vsyncpa [#allocation3 + $0x1], 1 }
 0x16f   :  { %353 = vsyncpa [#allocation6], 1 }
 0x170   :  { %354 = vsyncpa [#allocation4], 1 }
 0x171   :  { %356 = vsyncpa [#allocation4 + $0x1], 1 }

</bundles_post_ra>
